<compile_context>
chip_gen: v7x
topology: tpu7x:2x2x1
jax: 0.10.0
libtpu: 0.0.40
codegen_flags: <defaults>
</compile_context>

<pallas_src>
import jax
import jax.numpy as jnp
from jax import lax
from jax.experimental import pallas as pl
from jax.experimental.pallas import tpu as pltpu

_LANE = 128


def _round_up(x, m):
    return ((x + m - 1) // m) * m


def _tpu_vmem_and_kind():
    """Best-effort hardware query; falls back to conservative defaults."""
    vmem = None
    try:
        info = pltpu.get_tpu_info()
        vmem = getattr(info, "vmem_capacity_bytes", None)
    except Exception:
        vmem = None
    kind = ""
    try:
        kind = jax.devices()[0].device_kind.lower()
    except Exception:
        kind = ""
    return vmem, kind


def _make_adsn_kernel(num_modes, num_classes, tile_b, batch_size, narrow_pre_exp):
    def kernel(*refs):
        labels_ref = refs[0]                        # (TB, 1) int32
        w_ref = refs[1]                             # (TB, M) f32
        logits_refs = refs[2:2 + num_modes]         # M x (TB, C) native dtype
        out_ref = refs[2 + num_modes]               # (1, 8, 128) f32 partial sum

        tile_idx = pl.program_id(0)

        labels = labels_ref[...]                                     # (TB, 1)
        w = w_ref[...].astype(jnp.float32)                            # (TB, M)

        # Valid-row mask for the ragged tail tile.  NOTE: this must stay a
        # select applied BEFORE the jnp.sum reduction (garbage rows may be NaN).
        row_ids = tile_idx * tile_b + lax.broadcasted_iota(
            jnp.int32, (tile_b, 1), 0)
        valid = row_ids < batch_size                                  # (TB, 1)

        # In-kernel pick mask; no (B, C) one-hot ever hits HBM.
        col_ids = lax.broadcasted_iota(jnp.int32, (tile_b, num_classes), 1)
        pick = col_ids == labels                                      # (TB, C)

        total = jnp.zeros((tile_b, 1), jnp.float32)
        for m in range(num_modes):                  # unrolled; M is small (2-4)
            lg = logits_refs[m][...]
            if narrow_pre_exp and lg.dtype != jnp.float32:
                # v6e/v7x bf16 path: max is exact in bf16, the shift takes one
                # bf16 rounding; widen only at the exp input.
                mx = jnp.max(lg, axis=-1, keepdims=True)
                shifted = (lg - mx).astype(jnp.float32)               # (TB, C)
            else:
                lg_f32 = lg.astype(jnp.float32)
                mx = jnp.max(lg_f32, axis=-1, keepdims=True)
                shifted = lg_f32 - mx                                 # (TB, C)

            # CE = log(sum(exp(lg - mx))) - (lg[label] - mx)
            lse_sh = jnp.log(jnp.sum(jnp.exp(shifted), axis=-1, keepdims=True))
            picked_sh = jnp.sum(jnp.where(pick, shifted, 0.0),
                                axis=-1, keepdims=True)
            ce = lse_sh - picked_sh                                   # (TB, 1)
            total = total + w[:, m:m + 1] * ce

        total = jnp.where(valid, total, 0.0)
        # Lane-dense (8, 128) unmasked store of this tile's partial sum.
        out_ref[...] = jnp.full((1, 8, 128), jnp.sum(total), dtype=jnp.float32)

    return kernel


def adaptive_dsn_loss_cls(logits_list, labels, weights, reduction="mean",
                          tile_b=None):
    """JAX/Pallas port of AdaptiveDSNLoss_cls.forward (criterion='CE')."""
    num_modes = len(logits_list)
    logits_list = [jnp.asarray(l) for l in logits_list]
    batch_size, num_classes = logits_list[0].shape

    # --- weights: broadcast to (B, M) so tiled BlockSpecs never read OOB ------
    weights = jnp.asarray(weights, jnp.float32)
    if weights.ndim == 1:
        weights = weights[None, :]
    assert weights.shape[-1] == num_modes, (
        "The num of DSN you set was wrong. logits num: {}, expect {}".format(
            num_modes, weights.shape[-1]))
    weights = jnp.broadcast_to(weights, (batch_size, num_modes))

    # --- label handling -------------------------------------------------------
    labels = jnp.asarray(labels)
    if labels.ndim > 1 and labels.shape[-1] == num_classes and labels.shape[0] == batch_size:
        # One-hot / probability targets -> class indices.
        # TODO(synk): torch's runtime `labels.max()==1 and C!=2` guard can't be
        # evaluated statically; for C==2 one-hot targets torch's own path is
        # ill-defined, we argmax instead.
        labels_int = jnp.argmax(labels, axis=-1).astype(jnp.int32)
    else:
        labels_int = labels.reshape(-1).astype(jnp.int32)
    labels2d = labels_int.reshape(batch_size, 1)

    # --- generation-aware budgets --------------------------------------------
    vmem_cap, kind = _tpu_vmem_and_kind()
    if vmem_cap is not None and vmem_cap >= 100 * 1024 * 1024:
        budget = 48 << 20          # v5e / v6e: 128 MiB physical VMEM
        vmem_limit = 96 << 20
    else:
        budget = 20 << 20          # v7x (64 MiB) or unknown: stay conservative
        vmem_limit = 32 << 20
    # bf16 pre-exp compute only where the VPU has bf16 (v6e / v7x).
    narrow_pre_exp = ("v6" in kind) or ("v7" in kind)

    # --- VMEM footprint per batch row (lane-padded, double-buffered, + temps) -
    padded_c = _round_up(num_classes, _LANE)
    vmem_per_row = 0
    for l in logits_list:
        isz = jnp.dtype(l.dtype).itemsize
        vmem_per_row += 2 * isz * padded_c           # double-buffered input tile
    vmem_per_row += 12 * padded_c                    # f32 temps (shifted/exp/pick)
    vmem_per_row += 2 * 4 * _LANE * 2                # labels + weights tiles, padded

    # --- tile sizing ----------------------------------------------------------
    tb_budget = max(8, (budget // vmem_per_row) // 8 * 8)
    if tile_b is None:
        if batch_size >= 16:
            # Guarantee >= 2 grid steps so ("parallel",) can shard across the
            # two TensorCores on v7x; negligible cost on single-TC parts.
            tile_b = min(tb_budget, _round_up(pl.cdiv(batch_size, 2), 8))
        else:
            tile_b = min(tb_budget, batch_size)
    else:
        tile_b = min(tile_b, batch_size)
    assert tile_b == batch_size or tile_b % 8 == 0, "tile_b must be 8-aligned"
    num_tiles = pl.cdiv(batch_size, tile_b)

    # If a caller forces a huge tile_b, raise the scoped-VMEM limit accordingly
    # (capped below physical VMEM when known).
    est_footprint = tile_b * vmem_per_row + (2 << 20)
    if est_footprint > vmem_limit:
        phys = vmem_cap if vmem_cap else (64 << 20)
        vmem_limit = min(est_footprint, max(phys - (8 << 20), 32 << 20))

    kernel = _make_adsn_kernel(num_modes, num_classes, tile_b, batch_size,
                               narrow_pre_exp)

    in_specs = [
        pl.BlockSpec((tile_b, 1), lambda i: (i, 0)),               # labels
        pl.BlockSpec((tile_b, num_modes), lambda i: (i, 0)),       # weights
    ] + [
        pl.BlockSpec((tile_b, num_classes), lambda i: (i, 0))      # each modality
        for _ in range(num_modes)
    ]

    partials = pl.pallas_call(
        kernel,
        out_shape=jax.ShapeDtypeStruct((num_tiles, 8, 128), jnp.float32),
        grid=(num_tiles,),
        in_specs=in_specs,
        out_specs=pl.BlockSpec((1, 8, 128), lambda i: (i, 0, 0)),
        compiler_params=pltpu.CompilerParams(
            dimension_semantics=("parallel",),
            vmem_limit_bytes=int(vmem_limit),
        ),
    )(labels2d, weights, *logits_list)

    total = jnp.sum(partials[:, 0, 0])
    if reduction == "mean":
        return total / batch_size
    elif reduction == "sum":
        return total
    else:
        # TODO(synk): reduction='none' needs a per-sample output; not implemented.
        raise NotImplementedError("only 'mean' / 'sum' reductions implemented")


def _reference(logits_list, labels_int, weights):
    losses = []
    for l in logits_list:
        l = jnp.asarray(l).astype(jnp.float32)
        logp = jax.nn.log_softmax(l, axis=-1)
        ce = -jnp.take_along_axis(logp, jnp.asarray(labels_int)[:, None], axis=1)[:, 0]
        losses.append(ce)
    loss = jnp.stack(losses, axis=1)                     # (B, M)
    return jnp.mean(jnp.sum(jnp.asarray(weights, jnp.float32) * loss, axis=1))


if __name__ == "__main__":
    # --- test 1: tiny f32 problem, single tile --------------------------------
    key = jax.random.PRNGKey(0)
    B, C, M = 8, 4, 3
    k1, k2, k3 = jax.random.split(key, 3)
    logits_list = [jax.random.normal(k, (B, C), dtype=jnp.float32)
                   for k in jax.random.split(k1, M)]
    labels = jax.random.randint(k2, (B,), 0, C, dtype=jnp.int32)
    weights = jax.nn.softmax(jax.random.normal(k3, (B, M), dtype=jnp.float32),
                             axis=1)

    out = jax.block_until_ready(
        adaptive_dsn_loss_cls(logits_list, labels, weights, reduction="mean"))
    ref = _reference(logits_list, labels, weights)
    assert jnp.allclose(out, ref, atol=1e-5, rtol=1e-5), (out, ref)

    # --- test 2: bf16 logits, multi-tile grid with ragged tail ----------------
    # Looser tolerance: on v6e/v7x the shift (lg - max) is computed in bf16.
    B2, C2, M2 = 200, 10, 2
    k4, k5, k6 = jax.random.split(jax.random.PRNGKey(1), 3)
    logits2 = [jax.random.normal(k, (B2, C2), dtype=jnp.float32).astype(jnp.bfloat16)
               for k in jax.random.split(k4, M2)]
    labels2 = jax.random.randint(k5, (B2,), 0, C2, dtype=jnp.int32)
    weights2 = jax.nn.softmax(jax.random.normal(k6, (B2, M2), dtype=jnp.float32),
                              axis=1)

    out2 = jax.block_until_ready(
        adaptive_dsn_loss_cls(logits2, labels2, weights2, reduction="mean",
                              tile_b=64))
    ref2 = _reference(logits2, labels2, weights2)
    assert jnp.allclose(out2, ref2, atol=5e-3, rtol=5e-3), (out2, ref2)

    # --- test 3: one-hot labels + broadcastable (1, M) weights, auto tiling ---
    labels3 = jax.nn.one_hot(labels2, C2, dtype=jnp.float32)
    weights3 = jnp.full((1, M2), 1.0 / M2, jnp.float32)
    out3 = jax.block_until_ready(
        adaptive_dsn_loss_cls(logits2, labels3, weights3, reduction="sum"))
    ref3 = _reference(logits2, labels2, jnp.broadcast_to(weights3, (B2, M2))) * B2
    assert jnp.allclose(out3, ref3, atol=1e-2, rtol=5e-3), (out3, ref3)

    print("KERNEL_OK")
</pallas_src>

<mosaic_0001>
module attributes {stable_mosaic.version = 11 : i64} {
  func.func @kernel(%arg0: i32, %arg1: memref<8x1xi32, #tpu.memory_space<vmem>>, %arg2: memref<8x3xf32, #tpu.memory_space<vmem>>, %arg3: memref<8x4xf32, #tpu.memory_space<vmem>>, %arg4: memref<8x4xf32, #tpu.memory_space<vmem>>, %arg5: memref<8x4xf32, #tpu.memory_space<vmem>>, %arg6: memref<1x8x128xf32, #tpu.memory_space<vmem>>) attributes {dimension_semantics = [#tpu.dimension_semantics<parallel>], iteration_bounds = array<i64: 1>, scalar_prefetch = 0 : i64, scratch_operands = 0 : i64, tpu.core_type = #tpu.core_type<tc>, window_params = [{transform_indices = @transform_0, window_bounds = array<i64: 8, 1>}, {transform_indices = @transform_1, window_bounds = array<i64: 8, 3>}, {transform_indices = @transform_2, window_bounds = array<i64: 8, 4>}, {transform_indices = @transform_3, window_bounds = array<i64: 8, 4>}, {transform_indices = @transform_4, window_bounds = array<i64: 8, 4>}, {transform_indices = @transform_5, window_bounds = array<i64: 1, 8, 128>}]} {
    %c0 = arith.constant 0 : index
    %c0_0 = arith.constant 0 : index
    %0 = vector.load %arg1[%c0, %c0_0] : memref<8x1xi32, #tpu.memory_space<vmem>>, vector<8x1xi32>
    %c0_1 = arith.constant 0 : index
    %c0_2 = arith.constant 0 : index
    %1 = vector.load %arg2[%c0_1, %c0_2] : memref<8x3xf32, #tpu.memory_space<vmem>>, vector<8x3xf32>
    %c8_i32 = arith.constant 8 : i32
    %2 = arith.muli %arg0, %c8_i32 : i32
    %3 = tpu.iota {dimensions = array<i32: 0>} : vector<8x1xi32>
    %4 = vector.broadcast %2 : i32 to vector<8x1xi32>
    %5 = arith.addi %4, %3 : vector<8x1xi32>
    %c8_i32_3 = arith.constant 8 : i32
    %6 = vector.broadcast %c8_i32_3 : i32 to vector<8x1xi32>
    %7 = arith.cmpi slt, %5, %6 : vector<8x1xi32>
    %8 = tpu.iota {dimensions = array<i32: 1>} : vector<8x4xi32>
    %9 = vector.broadcast %0 : vector<8x1xi32> to vector<8x4xi32>
    %10 = arith.cmpi eq, %8, %9 : vector<8x4xi32>
    %cst = arith.constant 0.000000e+00 : f32
    %11 = vector.broadcast %cst : f32 to vector<8x1xf32>
    %c0_4 = arith.constant 0 : index
    %c0_5 = arith.constant 0 : index
    %12 = vector.load %arg3[%c0_4, %c0_5] : memref<8x4xf32, #tpu.memory_space<vmem>>, vector<8x4xf32>
    %cst_6 = arith.constant dense<0xFF800000> : vector<8xf32>
    %13 = vector.multi_reduction <maximumf>, %12, %cst_6 [1] : vector<8x4xf32> to vector<8xf32>
    %14 = vector.shape_cast %13 : vector<8xf32> to vector<8x1xf32>
    %15 = vector.broadcast %14 : vector<8x1xf32> to vector<8x4xf32>
    %16 = arith.subf %12, %15 : vector<8x4xf32>
    %17 = math.exp %16 : vector<8x4xf32>
    %cst_7 = arith.constant dense<0.000000e+00> : vector<8xf32>
    %18 = vector.multi_reduction <add>, %17, %cst_7 [1] : vector<8x4xf32> to vector<8xf32>
    %19 = vector.shape_cast %18 : vector<8xf32> to vector<8x1xf32>
    %20 = math.log %19 : vector<8x1xf32>
    %cst_8 = arith.constant 0.000000e+00 : f32
    %21 = vector.broadcast %cst_8 : f32 to vector<8x4xf32>
    %22 = arith.select %10, %16, %21 : vector<8x4xi1>, vector<8x4xf32>
    %cst_9 = arith.constant dense<0.000000e+00> : vector<8xf32>
    %23 = vector.multi_reduction <add>, %22, %cst_9 [1] : vector<8x4xf32> to vector<8xf32>
    %24 = vector.shape_cast %23 : vector<8xf32> to vector<8x1xf32>
    %25 = arith.subf %20, %24 : vector<8x1xf32>
    %26 = vector.extract_strided_slice %1 {offsets = [0, 0], sizes = [8, 1], strides = [1, 1]} : vector<8x3xf32> to vector<8x1xf32>
    %27 = arith.mulf %26, %25 : vector<8x1xf32>
    %28 = arith.addf %11, %27 : vector<8x1xf32>
    %c0_10 = arith.constant 0 : index
    %c0_11 = arith.constant 0 : index
    %29 = vector.load %arg4[%c0_10, %c0_11] : memref<8x4xf32, #tpu.memory_space<vmem>>, vector<8x4xf32>
    %cst_12 = arith.constant dense<0xFF800000> : vector<8xf32>
    %30 = vector.multi_reduction <maximumf>, %29, %cst_12 [1] : vector<8x4xf32> to vector<8xf32>
    %31 = vector.shape_cast %30 : vector<8xf32> to vector<8x1xf32>
    %32 = vector.broadcast %31 : vector<8x1xf32> to vector<8x4xf32>
    %33 = arith.subf %29, %32 : vector<8x4xf32>
    %34 = math.exp %33 : vector<8x4xf32>
    %cst_13 = arith.constant dense<0.000000e+00> : vector<8xf32>
    %35 = vector.multi_reduction <add>, %34, %cst_13 [1] : vector<8x4xf32> to vector<8xf32>
    %36 = vector.shape_cast %35 : vector<8xf32> to vector<8x1xf32>
    %37 = math.log %36 : vector<8x1xf32>
    %cst_14 = arith.constant 0.000000e+00 : f32
    %38 = vector.broadcast %cst_14 : f32 to vector<8x4xf32>
    %39 = arith.select %10, %33, %38 : vector<8x4xi1>, vector<8x4xf32>
    %cst_15 = arith.constant dense<0.000000e+00> : vector<8xf32>
    %40 = vector.multi_reduction <add>, %39, %cst_15 [1] : vector<8x4xf32> to vector<8xf32>
    %41 = vector.shape_cast %40 : vector<8xf32> to vector<8x1xf32>
    %42 = arith.subf %37, %41 : vector<8x1xf32>
    %43 = vector.extract_strided_slice %1 {offsets = [0, 1], sizes = [8, 1], strides = [1, 1]} : vector<8x3xf32> to vector<8x1xf32>
    %44 = arith.mulf %43, %42 : vector<8x1xf32>
    %45 = arith.addf %28, %44 : vector<8x1xf32>
    %c0_16 = arith.constant 0 : index
    %c0_17 = arith.constant 0 : index
    %46 = vector.load %arg5[%c0_16, %c0_17] : memref<8x4xf32, #tpu.memory_space<vmem>>, vector<8x4xf32>
    %cst_18 = arith.constant dense<0xFF800000> : vector<8xf32>
    %47 = vector.multi_reduction <maximumf>, %46, %cst_18 [1] : vector<8x4xf32> to vector<8xf32>
    %48 = vector.shape_cast %47 : vector<8xf32> to vector<8x1xf32>
    %49 = vector.broadcast %48 : vector<8x1xf32> to vector<8x4xf32>
    %50 = arith.subf %46, %49 : vector<8x4xf32>
    %51 = math.exp %50 : vector<8x4xf32>
    %cst_19 = arith.constant dense<0.000000e+00> : vector<8xf32>
    %52 = vector.multi_reduction <add>, %51, %cst_19 [1] : vector<8x4xf32> to vector<8xf32>
    %53 = vector.shape_cast %52 : vector<8xf32> to vector<8x1xf32>
    %54 = math.log %53 : vector<8x1xf32>
    %cst_20 = arith.constant 0.000000e+00 : f32
    %55 = vector.broadcast %cst_20 : f32 to vector<8x4xf32>
    %56 = arith.select %10, %50, %55 : vector<8x4xi1>, vector<8x4xf32>
    %cst_21 = arith.constant dense<0.000000e+00> : vector<8xf32>
    %57 = vector.multi_reduction <add>, %56, %cst_21 [1] : vector<8x4xf32> to vector<8xf32>
    %58 = vector.shape_cast %57 : vector<8xf32> to vector<8x1xf32>
    %59 = arith.subf %54, %58 : vector<8x1xf32>
    %60 = vector.extract_strided_slice %1 {offsets = [0, 2], sizes = [8, 1], strides = [1, 1]} : vector<8x3xf32> to vector<8x1xf32>
    %61 = arith.mulf %60, %59 : vector<8x1xf32>
    %62 = arith.addf %45, %61 : vector<8x1xf32>
    %cst_22 = arith.constant 0.000000e+00 : f32
    %63 = vector.broadcast %cst_22 : f32 to vector<8x1xf32>
    %64 = arith.select %7, %62, %63 : vector<8x1xi1>, vector<8x1xf32>
    %65 = vector.shape_cast %64 : vector<8x1xf32> to vector<1x8x1xf32>
    %cst_23 = arith.constant dense<0.000000e+00> : vector<1xf32>
    %66 = vector.multi_reduction <add>, %65, %cst_23 [1, 2] : vector<1x8x1xf32> to vector<1xf32>
    %67 = vector.shape_cast %66 : vector<1xf32> to vector<1x1x1xf32>
    %68 = vector.extract %67[0, 0, 0] : f32 from vector<1x1x1xf32>
    %69 = vector.broadcast %68 : f32 to vector<1x8x128xf32>
    %c0_24 = arith.constant 0 : index
    %c0_25 = arith.constant 0 : index
    %c0_26 = arith.constant 0 : index
    %70 = vector.load %arg6[%c0_24, %c0_25, %c0_26] : memref<1x8x128xf32, #tpu.memory_space<vmem>>, vector<1x8x128xf32>
    tpu.vector_store %arg6[%c0_24, %c0_25, %c0_26], %69 {strides = array<i32>} : memref<1x8x128xf32, #tpu.memory_space<vmem>>, vector<1x8x128xf32>,
    return
  }
  func.func @transform_0(%arg0: i32) -> (i32, i32) {
    %c0_i32 = arith.constant 0 : i32
    %c0_i32_0 = arith.constant 0 : i32
    return %arg0, %c0_i32 : i32, i32
  }
  func.func @transform_1(%arg0: i32) -> (i32, i32) {
    %c0_i32 = arith.constant 0 : i32
    %c0_i32_0 = arith.constant 0 : i32
    return %arg0, %c0_i32 : i32, i32
  }
  func.func @transform_2(%arg0: i32) -> (i32, i32) {
    %c0_i32 = arith.constant 0 : i32
    %c0_i32_0 = arith.constant 0 : i32
    return %arg0, %c0_i32 : i32, i32
  }
  func.func @transform_3(%arg0: i32) -> (i32, i32) {
    %c0_i32 = arith.constant 0 : i32
    %c0_i32_0 = arith.constant 0 : i32
    return %arg0, %c0_i32 : i32, i32
  }
  func.func @transform_4(%arg0: i32) -> (i32, i32) {
    %c0_i32 = arith.constant 0 : i32
    %c0_i32_0 = arith.constant 0 : i32
    return %arg0, %c0_i32 : i32, i32
  }
  func.func @transform_5(%arg0: i32) -> (i32, i32, i32) {
    %c0_i32 = arith.constant 0 : i32
    %c0_i32_0 = arith.constant 0 : i32
    %c0_i32_1 = arith.constant 0 : i32
    return %arg0, %c0_i32, %c0_i32_0 : i32, i32, i32
  }
}

</mosaic_0001>

<bundles_post_ra>
// kernel: tpu_custom_call.1
= control target key start
LH: loop header
LB: loop body
LE: loop exit
PB: predicated region body
PF: predicated region fallthrough
CT: control target
= control target key end

     0   :  { %vm36_vm0 = vcmask 31744   ;;  %v173_v3 = vmov 0   ;;  %s243_s0 = inlined_call_operand.vmem [shape: s32[8,1], index: 0, kind: input, shape index: {}]   ;;  %s244_s1 = inlined_call_operand.vmem [shape: f32[8,3], index: 1, kind: input, shape index: {}]   ;;  %s245_s2 = inlined_call_operand.vmem [shape: f32[8,4], index: 2, kind: input, shape index: {}]   ;;  %s246_s3 = inlined_call_operand.vmem [shape: f32[8,4], index: 3, kind: input, shape index: {}]   ;;  %s247_s4 = inlined_call_operand.vmem [shape: f32[8,4], index: 4, kind: input, shape index: {}]   ;;  %s248_s5 = inlined_call_operand.hbm [shape: f32[1,8,128], index: 5, kind: output, shape index: {}]  }
   0x1   :  { %v55_v0 = vld [vmem:[%s246_s3] sm:$0xff]  ;;  %135 = vset.pattern.permute.xlu1 %v173_v3  ;;  %136 = vset.pattern.permute.xlu0 %v173_v3 }
   0x2   :  { %v21_v1 = vld [vmem:[%s243_s0] sm:$0xff]  ;;  %v56_v4 = vsel %vm36_vm0, %v55_v0, -inf }
   0x3   :  { %v78_v2 = vld [vmem:[%s247_s4] sm:$0xff] }
   0x4   :  { %10 = vsyncpa [#allocation3], 0  ;;  %57 = vmax.xlane.f32.xlu0 %v56_v4  ;;  %32 = vperm.xlu1 %135, %v21_v1   ;;  %v79_v5 = vsel %vm36_vm0, %v78_v2, -inf  ;;  %v35_v6 = vld [vmem:[%s245_s2] sm:$0xff]  ;;  %v29_v14 = vlaneseq  ;;  %s174_s4 = smov 127   ;;  %s175_s25 = smov 126  }
   0x5   :  { %v37_v7 = vsel %vm36_vm0, %v35_v6, -inf  ;;  %v22_v37 = vld [vmem:[%s244_s1] sm:$0xff]  ;;  %vm102_vm2 = vcmask 7168   ;;  %s176_s1 = smov [#allocation2]  }
   0x6   :  { %v30_v15 = vand.u32 127, %v29_v14  ;;  %s121_s26 = sshll.u32 %s176_s1, 4  ;;  %s122_s26 = int_to_ptr.vmem [resolvable:$true] %s121_s26 }
   0x7   :  { %s149_s28 = scalar_lea.vmem %s122_s26, 128  ;;  %p154_p1 = scmp.lt.s32.totalorder %s122_s26, %s122_s26 }
   0x8   :  { %80 = vmax.xlane.f32.xlu0 %v79_v5  ;;  %p150_p0 = scmp.ne.s32.totalorder %s122_s26, %s149_s28  ;;  %p155_p2 = scmp.lt.s32.totalorder %s149_s28, %s149_s28 }
   0xa   :  { %p156_p3 = por %p155_p2, %p154_p1 }
   0xc   :  { %p157_p4 = pnand %p156_p3, %p150_p0 }
  0x28   :  { %38 = vmax.xlane.f32.xlu1 %v37_v7 }
  0x83   :  { %v33_v17 = vpop.permute.xlu1 %32 }
  0x84   :  { %vm34_vm1 = vcmp.eq.s32.totalorder %v30_v15, %v33_v17 }
  0x91   :  { %v58_v8 = vpop.xlane.xlu0 %57 }
  0x92   :  { %v59_v9 = vsub.f32 %v55_v0, %v58_v8 }
  0x94   :  { %v60_v10 = vmul.f32 1.442695, %v59_v9  ;;  %v67_v21 = vsel %vm34_vm1, %v59_v9, 0.0 }
  0x95   :  { %v81_v11 = vpop.xlane.xlu0 %80  ;;  %v68_v22 = vsel %vm36_vm0, %v67_v21, 0.0 }
  0x96   :  { %137 = vpow2.f32 %v60_v10  ;;  %v82_v12 = vsub.f32 %v78_v2, %v81_v11 }
  0x98   :  { %v83_v13 = vmul.f32 1.442695, %v82_v12  ;;  %v90_v23 = vsel %vm34_vm1, %v82_v12, 0.0 }
  0x99   :  { %v91_v24 = vsel %vm36_vm0, %v90_v23, 0.0 }
  0x9a   :  { %139 = vpow2.f32 %v83_v13 }
  0xa0   :  { %v138_v16 = vpop.eup %137 }
  0xa1   :  { %v62_v18 = vsel %vm36_vm0, %v138_v16, 0.0 }
  0xa2   :  { %63 = vadd.xlane.f32.xlu0 %v62_v18 }
  0xa4   :  { %v140_v19 = vpop.eup %139 }
  0xa5   :  { %v85_v20 = vsel %vm36_vm0, %v140_v19, 0.0 }
  0xa6   :  { %86 = vadd.xlane.f32.xlu0 %v85_v20 }
  0xaa   :  { %69 = vadd.xlane.f32.xlu0 %v68_v22 }
  0xae   :  { %92 = vadd.xlane.f32.xlu0 %v91_v24 }
  0xb5   :  { %v39_v25 = vpop.xlane.xlu1 %38 }
  0xb6   :  { %v40_v26 = vsub.f32 %v35_v6, %v39_v25 }
  0xb8   :  { %v41_v27 = vmul.f32 1.442695, %v40_v26  ;;  %v48_v28 = vsel %vm34_vm1, %v40_v26, 0.0 }
  0xb9   :  { %v49_v29 = vsel %vm36_vm0, %v48_v28, 0.0 }
  0xba   :  { %141 = vpow2.f32 %v41_v27  ;;  %50 = vadd.xlane.f32.xlu0 %v49_v29 }
  0xc4   :  { %v142_v30 = vpop.eup %141 }
  0xc5   :  { %v43_v31 = vsel %vm36_vm0, %v142_v30, 0.0 }
  0xc6   :  { %44 = vadd.xlane.f32.xlu0 %v43_v31 }
 0x12f   :  { %v64_v32 = vpop.xlane.xlu0 %63 }
 0x130   :  { %143 = vlog2.f32 %v64_v32 }
 0x133   :  { %v87_v33 = vpop.xlane.xlu0 %86 }
 0x134   :  { %145 = vlog2.f32 %v87_v33 }
 0x137   :  { %v70_v35 = vpop.xlane.xlu0 %69 }
 0x13a   :  { %v144_v34 = vpop.eup %143 }
 0x13b   :  { %v66_v36 = vmul.f32 0.6931472, %v144_v34  ;;  %v93_v42 = vpop.xlane.xlu0 %92 }
 0x13d   :  { %v71_v38 = vsub.f32 %v66_v36, %v70_v35 }
 0x13e   :  { %v146_v39 = vpop.eup %145 }
 0x13f   :  { %v72_v40 = vmul.f32 %v71_v38, %v22_v37  ;;  %v89_v41 = vmul.f32 0.6931472, %v146_v39 }
 0x141   :  { %v94_v43 = vsub.f32 %v89_v41, %v93_v42  ;;  %74 = vrot.lane.b32.xlu0 %v72_v40, %s174_s4 }
 0x143   :  { %v95_v44 = vmul.f32 %v94_v43, %v22_v37 }
 0x145   :  { %97 = vrot.lane.b32.xlu1 %v95_v44, %s175_s25 }
 0x147   :  { %v51_v45 = vpop.xlane.xlu0 %50 }
 0x153   :  { %v45_v46 = vpop.xlane.xlu0 %44 }
 0x154   :  { %147 = vlog2.f32 %v45_v46 }
 0x15e   :  { %v148_v47 = vpop.eup %147 }
 0x15f   :  { %v47_v48 = vmul.f32 0.6931472, %v148_v47 }
 0x161   :  { %v52_v49 = vsub.f32 %v47_v48, %v51_v45 }
 0x163   :  { %v53_v51 = vmul.f32 %v52_v49, %v22_v37 }
 0x1b3   :  { %v75_v50 = vpop.permute.xlu0 %74 }
 0x1b4   :  { %v77_v52 = vadd.f32 %v75_v50, %v53_v51 }
 0x1b7   :  { %v98_v53 = vpop.permute.xlu1 %97 }
 0x1b8   :  { %v100_v54 = vadd.f32 %v98_v53, %v77_v52 }
 0x1ba   :  { %v103_v55 = vsel %vm102_vm2, %v100_v54, 0.0 }
 0x1bb   :  { %104 = vadd.xlane.f32.xlu0 %v103_v55 }
 0x248   :  { %v105_v56 = vpop.xlane.xlu0 %104 }
 0x249   :  { %v106_v57 = vrot.slane %v105_v56, 4 }
 0x24b   :  { %v107_v58 = vadd.f32 %v106_v57, %v105_v56 }
 0x24d   :  { %v108_v59 = vrot.slane %v107_v58, 2 }
 0x24f   :  { %v109_v60 = vadd.f32 %v108_v59, %v107_v58 }
 0x251   :  { %v110_v61 = vrot.slane %v109_v60, 1 }
 0x253   :  { %v111_v62 = vadd.f32 %v110_v61, %v109_v60 }
 0x255   :  { %129 = vpush %v111_v62 }
 0x286   :  { %s130_s27 = spop %129 }
 0x287   :  { %v113_v63 = vstv %s130_s27 }
 0x288   :  { %114 = vst [vmem:[#allocation2] sm:$0xff] %v113_v63 }
 0x289   :  { %160 = shalt.err (!%p157_p4)
}
 0x28a   :  { %s161_s6 = scalar_lea.hbm %s248_s5, 128 }
 0x28b   :  { %p162_p5 = scmp.ne.s32.totalorder %s248_s5, %s161_s6  ;;  %p165_p6 = scmp.lt.u32.totalorder %s161_s6, %s248_s5 }
 0x28d   :  { %p167_p7 = pnand %p165_p6, %p162_p5 }
 0x28f   :  { %170 = shalt.err (!%p167_p7)
}
 0x290   :  { %124 = dma.vmem_to_hbm [thread:$0]  %s122_s26, 128, %s248_s5, [#allocation3]  }
 0x291   :  { %171 = dma.done.wait [#allocation3], 128  }
 0x292   :  { %172 = vsyncadd [#allocation3], 4294967168 }
 0x293   :  { %128 = vsyncpa [#allocation3], 1 }

</bundles_post_ra>
